<compile_context>
chip_gen: v7x
topology: tpu7x:2x2x1
jax: 0.10.0
libtpu: 0.0.40
codegen_flags: <defaults>
</compile_context>

<pallas_src>
import jax
import jax.numpy as jnp
from jax.experimental import pallas as pl
from jax.experimental.pallas import tpu as pltpu

H, W, C = 7, 7, 96
WPAD = 8              # W padded to one 8-sublane tile
COUT = 128            # out-channel dim padded to a full 128-lane vreg (unmasked store)
NPIX = H * W          # 49 real pixels for the batch statistics
EPS = 1e-5

_N_TAPS = 9
_GAMMA_ROW = _N_TAPS * WPAD          # 72
_BETA_ROW = _GAMMA_ROW + 1           # 73
_PARAM_ROWS = 80                     # padded up to a multiple of 8 sublanes


def _fused_kernel(xp_ref, params_ref, pw_ref, o_ref):
    # xp_ref:     (H+2, WPAD+2, C) f32  zero-padded, pre-ReLU input (ReLU(0)=0, padding commutes)
    # params_ref: (_PARAM_ROWS, C) f32  rows [8i : 8i+8] = depthwise tap i (sublane pre-expanded),
    #                                   row 72 = gamma, row 73 = beta, rest zero
    # pw_ref:     (C, COUT) bf16        pointwise 1x1 weights [c_in, c_out zero-padded to 128]
    # o_ref:      (H*WPAD, COUT) f32

    # --- ReLU once on the whole padded block ---
    xp = jnp.maximum(xp_ref[...], 0.0)                                   # (9, 10, 96)

    # --- hoist the 3 W-shifted (sublane) windows out of the 3x3 unroll ---
    xs = (xp[:, 0:WPAD, :], xp[:, 1:1 + WPAD, :], xp[:, 2:2 + WPAD, :])  # each (9, 8, 96)

    # --- depthwise 3x3 conv: 9 shifted multiply-adds into a (7, 8, 96) accumulator ---
    # Taps are pre-expanded to (8, 96) -> no sublane broadcast; dh shift is a leading-dim slice.
    acc = None
    for dh in range(3):
        for dw in range(3):
            i = 3 * dh + dw
            tap = params_ref[8 * i:8 * i + 8, :]                         # (8, 96), aligned
            contrib = xs[dw][dh:dh + H, :, :] * tap                      # (7, 8, 96)
            acc = contrib if acc is None else acc + contrib

    # --- BatchNorm batch stats (training mode, biased variance) over the 49 REAL pixels only ---
    # Reduce the leading dim first (cheap vreg adds), then sum sublanes w = 0..6 so the padding
    # column w = 7 (spill-over garbage) never enters the statistics.
    ps1 = jnp.sum(acc, axis=0)                                           # (8, 96)
    ps2 = jnp.sum(acc * acc, axis=0)                                     # (8, 96)
    s1 = jnp.sum(ps1[:W, :], axis=0, keepdims=True)                      # (1, 96)
    s2 = jnp.sum(ps2[:W, :], axis=0, keepdims=True)                      # (1, 96)

    inv_n = 1.0 / NPIX
    mean = s1 * inv_n
    var = jnp.maximum(s2 * inv_n - mean * mean, 0.0)                     # one-pass variance
    gamma = params_ref[_GAMMA_ROW:_GAMMA_ROW + 1, :]                     # (1, 96)
    beta = params_ref[_BETA_ROW:_BETA_ROW + 1, :]                        # (1, 96)
    scale = gamma * jax.lax.rsqrt(var + EPS)                             # (1, 96)
    bias = beta - mean * scale                                           # (1, 96)

    # --- BN fully folded into the activations, then ONE MXU matmul (bf16 operands, f32 acc) ---
    acc2d = acc.reshape(H * WPAD, C)                                     # layout-free (56, 96)
    y = (acc2d * scale + bias).astype(jnp.bfloat16)                      # (56, 96)
    o_ref[...] = jnp.dot(y, pw_ref[...],
                         preferred_element_type=jnp.float32)             # (56, 128) full store


@jax.jit
def fused_forward(x_nchw, dww, gamma, beta, pww):
    """x_nchw: (1, C, H, W) float32 -> (1, C, H, W) float32."""
    # Layout glue (tiny, fused by XLA inside this jit): NCHW -> HWC, zero-pad to (H+2, WPAD+2, C).
    x_hwc = jnp.transpose(x_nchw[0], (1, 2, 0))                          # (7, 7, 96)
    xp = jnp.pad(x_hwc, ((1, 1), (1, WPAD + 1 - W), (0, 0)))             # (9, 10, 96)

    # One packed parameter block: 9 sublane-expanded depthwise taps + gamma + beta (single DMA).
    taps = jnp.broadcast_to(dww.reshape(_N_TAPS, 1, C),
                            (_N_TAPS, WPAD, C)).reshape(_N_TAPS * WPAD, C)          # (72, 96)
    params = jnp.concatenate(
        [taps, gamma.reshape(1, C), beta.reshape(1, C),
         jnp.zeros((_PARAM_ROWS - _BETA_ROW - 1, C), jnp.float32)], axis=0)         # (80, 96)

    # Pointwise weights: pre-pad out-channels to 128 lanes, pre-cast to bf16 (halves that DMA).
    pw_pad = jnp.pad(pww, ((0, 0), (0, COUT - C))).astype(jnp.bfloat16)              # (96, 128)

    out2d = pl.pallas_call(
        _fused_kernel,
        out_shape=jax.ShapeDtypeStruct((H * WPAD, COUT), jnp.float32),
        in_specs=[pl.BlockSpec(memory_space=pltpu.MemorySpace.VMEM)] * 3,
        out_specs=pl.BlockSpec(memory_space=pltpu.MemorySpace.VMEM),
        cost_estimate=pl.CostEstimate(
            flops=2 * NPIX * C * 9 + 2 * H * WPAD * C * COUT,
            transcendentals=C,
            bytes_accessed=(xp.size * 4 + params.size * 4 + pw_pad.size * 2
                            + H * WPAD * COUT * 4)),
    )(xp, params, pw_pad)

    # Drop the sublane/lane padding and go back to NCHW.
    out_hwc = out2d.reshape(H, WPAD, COUT)[:, :W, :C]                    # (7, 7, 96)
    return jnp.transpose(out_hwc, (2, 0, 1))[None]                       # (1, 96, 7, 7)


def reference(x_nchw, dww, gamma, beta, pww):
    """Pure-JAX f32 reference with the module's semantics (for validation)."""
    x = jnp.maximum(x_nchw, 0.0)
    w_dw = jnp.transpose(dww, (2, 0, 1))[:, None, :, :]                  # (C,1,3,3) OIHW
    y = jax.lax.conv_general_dilated(
        x, w_dw, (1, 1), ((1, 1), (1, 1)),
        dimension_numbers=("NCHW", "OIHW", "NCHW"), feature_group_count=C)
    mean = jnp.mean(y, axis=(0, 2, 3), keepdims=True)
    var = jnp.mean((y - mean) ** 2, axis=(0, 2, 3), keepdims=True)
    y = (y - mean) * jax.lax.rsqrt(var + EPS)
    y = y * gamma[None, :, None, None] + beta[None, :, None, None]
    w_pw = jnp.transpose(pww, (1, 0))[:, :, None, None]                  # (Cout,Cin,1,1)
    return jax.lax.conv_general_dilated(
        y, w_pw, (1, 1), ((0, 0), (0, 0)),
        dimension_numbers=("NCHW", "OIHW", "NCHW"))


if __name__ == "__main__":
    key = jax.random.PRNGKey(0)
    k_x, k_dw, k_g, k_b, k_pw = jax.random.split(key, 5)

    # Module-consistent shapes: input (1, 96, 7, 7).
    x = jax.random.normal(k_x, (1, C, H, W), dtype=jnp.float32)

    # Deterministic synthetic parameters.
    dww = 0.1 * jax.random.normal(k_dw, (3, 3, C), dtype=jnp.float32)    # depthwise (kh,kw,C)
    gamma = 1.0 + 0.1 * jax.random.normal(k_g, (C,), dtype=jnp.float32)  # BN weight
    beta = 0.1 * jax.random.normal(k_b, (C,), dtype=jnp.float32)         # BN bias
    pww = 0.1 * jax.random.normal(k_pw, (C, C), dtype=jnp.float32)       # pointwise (cin,cout)

    out = jax.block_until_ready(fused_forward(x, dww, gamma, beta, pww))
    ref = jax.block_until_ready(reference(x, dww, gamma, beta, pww))

    assert out.shape == (1, C, H, W), out.shape
    # Tolerance accounts for bf16 MXU operands (f32 accumulation); semantic bugs would be O(1).
    assert jnp.allclose(out, ref, rtol=2e-2, atol=2e-2), float(jnp.max(jnp.abs(out - ref)))
    print("KERNEL_OK")
</pallas_src>

<mosaic_0001>
module attributes {stable_mosaic.version = 11 : i64} {
  func.func @_fused_kernel(%arg0: memref<9x10x96xf32, #tpu.memory_space<vmem>>, %arg1: memref<80x96xf32, #tpu.memory_space<vmem>>, %arg2: memref<96x128xbf16, #tpu.memory_space<vmem>>, %arg3: memref<56x128xf32, #tpu.memory_space<vmem>>) attributes {dimension_semantics = [], scalar_prefetch = 0 : i64, scratch_operands = 0 : i64, tpu.core_type = #tpu.core_type<tc>} {
    %c0 = arith.constant 0 : index
    %c0_0 = arith.constant 0 : index
    %c0_1 = arith.constant 0 : index
    %0 = vector.load %arg0[%c0, %c0_0, %c0_1] : memref<9x10x96xf32, #tpu.memory_space<vmem>>, vector<9x10x96xf32>
    %cst = arith.constant 0.000000e+00 : f32
    %1 = vector.broadcast %cst : f32 to vector<9x10x96xf32>
    %2 = arith.maximumf %0, %1 : vector<9x10x96xf32>
    %3 = vector.extract_strided_slice %2 {offsets = [0, 0, 0], sizes = [9, 8, 96], strides = [1, 1, 1]} : vector<9x10x96xf32> to vector<9x8x96xf32>
    %4 = vector.extract_strided_slice %2 {offsets = [0, 1, 0], sizes = [9, 8, 96], strides = [1, 1, 1]} : vector<9x10x96xf32> to vector<9x8x96xf32>
    %5 = vector.extract_strided_slice %2 {offsets = [0, 2, 0], sizes = [9, 8, 96], strides = [1, 1, 1]} : vector<9x10x96xf32> to vector<9x8x96xf32>
    %c0_2 = arith.constant 0 : index
    %c0_3 = arith.constant 0 : index
    %6 = vector.load %arg1[%c0_2, %c0_3] : memref<80x96xf32, #tpu.memory_space<vmem>>, vector<8x96xf32>
    %7 = vector.extract_strided_slice %3 {offsets = [0, 0, 0], sizes = [7, 8, 96], strides = [1, 1, 1]} : vector<9x8x96xf32> to vector<7x8x96xf32>
    %8 = vector.shape_cast %6 : vector<8x96xf32> to vector<1x8x96xf32>
    %9 = vector.broadcast %8 : vector<1x8x96xf32> to vector<7x8x96xf32>
    %10 = arith.mulf %7, %9 : vector<7x8x96xf32>
    %c8 = arith.constant 8 : index
    %c0_4 = arith.constant 0 : index
    %11 = vector.load %arg1[%c8, %c0_4] : memref<80x96xf32, #tpu.memory_space<vmem>>, vector<8x96xf32>
    %12 = vector.extract_strided_slice %4 {offsets = [0, 0, 0], sizes = [7, 8, 96], strides = [1, 1, 1]} : vector<9x8x96xf32> to vector<7x8x96xf32>
    %13 = vector.shape_cast %11 : vector<8x96xf32> to vector<1x8x96xf32>
    %14 = vector.broadcast %13 : vector<1x8x96xf32> to vector<7x8x96xf32>
    %15 = arith.mulf %12, %14 : vector<7x8x96xf32>
    %16 = arith.addf %10, %15 : vector<7x8x96xf32>
    %c16 = arith.constant 16 : index
    %c0_5 = arith.constant 0 : index
    %17 = vector.load %arg1[%c16, %c0_5] : memref<80x96xf32, #tpu.memory_space<vmem>>, vector<8x96xf32>
    %18 = vector.extract_strided_slice %5 {offsets = [0, 0, 0], sizes = [7, 8, 96], strides = [1, 1, 1]} : vector<9x8x96xf32> to vector<7x8x96xf32>
    %19 = vector.shape_cast %17 : vector<8x96xf32> to vector<1x8x96xf32>
    %20 = vector.broadcast %19 : vector<1x8x96xf32> to vector<7x8x96xf32>
    %21 = arith.mulf %18, %20 : vector<7x8x96xf32>
    %22 = arith.addf %16, %21 : vector<7x8x96xf32>
    %c24 = arith.constant 24 : index
    %c0_6 = arith.constant 0 : index
    %23 = vector.load %arg1[%c24, %c0_6] : memref<80x96xf32, #tpu.memory_space<vmem>>, vector<8x96xf32>
    %24 = vector.extract_strided_slice %3 {offsets = [1, 0, 0], sizes = [7, 8, 96], strides = [1, 1, 1]} : vector<9x8x96xf32> to vector<7x8x96xf32>
    %25 = vector.shape_cast %23 : vector<8x96xf32> to vector<1x8x96xf32>
    %26 = vector.broadcast %25 : vector<1x8x96xf32> to vector<7x8x96xf32>
    %27 = arith.mulf %24, %26 : vector<7x8x96xf32>
    %28 = arith.addf %22, %27 : vector<7x8x96xf32>
    %c32 = arith.constant 32 : index
    %c0_7 = arith.constant 0 : index
    %29 = vector.load %arg1[%c32, %c0_7] : memref<80x96xf32, #tpu.memory_space<vmem>>, vector<8x96xf32>
    %30 = vector.extract_strided_slice %4 {offsets = [1, 0, 0], sizes = [7, 8, 96], strides = [1, 1, 1]} : vector<9x8x96xf32> to vector<7x8x96xf32>
    %31 = vector.shape_cast %29 : vector<8x96xf32> to vector<1x8x96xf32>
    %32 = vector.broadcast %31 : vector<1x8x96xf32> to vector<7x8x96xf32>
    %33 = arith.mulf %30, %32 : vector<7x8x96xf32>
    %34 = arith.addf %28, %33 : vector<7x8x96xf32>
    %c40 = arith.constant 40 : index
    %c0_8 = arith.constant 0 : index
    %35 = vector.load %arg1[%c40, %c0_8] : memref<80x96xf32, #tpu.memory_space<vmem>>, vector<8x96xf32>
    %36 = vector.extract_strided_slice %5 {offsets = [1, 0, 0], sizes = [7, 8, 96], strides = [1, 1, 1]} : vector<9x8x96xf32> to vector<7x8x96xf32>
    %37 = vector.shape_cast %35 : vector<8x96xf32> to vector<1x8x96xf32>
    %38 = vector.broadcast %37 : vector<1x8x96xf32> to vector<7x8x96xf32>
    %39 = arith.mulf %36, %38 : vector<7x8x96xf32>
    %40 = arith.addf %34, %39 : vector<7x8x96xf32>
    %c48 = arith.constant 48 : index
    %c0_9 = arith.constant 0 : index
    %41 = vector.load %arg1[%c48, %c0_9] : memref<80x96xf32, #tpu.memory_space<vmem>>, vector<8x96xf32>
    %42 = vector.extract_strided_slice %3 {offsets = [2, 0, 0], sizes = [7, 8, 96], strides = [1, 1, 1]} : vector<9x8x96xf32> to vector<7x8x96xf32>
    %43 = vector.shape_cast %41 : vector<8x96xf32> to vector<1x8x96xf32>
    %44 = vector.broadcast %43 : vector<1x8x96xf32> to vector<7x8x96xf32>
    %45 = arith.mulf %42, %44 : vector<7x8x96xf32>
    %46 = arith.addf %40, %45 : vector<7x8x96xf32>
    %c56 = arith.constant 56 : index
    %c0_10 = arith.constant 0 : index
    %47 = vector.load %arg1[%c56, %c0_10] : memref<80x96xf32, #tpu.memory_space<vmem>>, vector<8x96xf32>
    %48 = vector.extract_strided_slice %4 {offsets = [2, 0, 0], sizes = [7, 8, 96], strides = [1, 1, 1]} : vector<9x8x96xf32> to vector<7x8x96xf32>
    %49 = vector.shape_cast %47 : vector<8x96xf32> to vector<1x8x96xf32>
    %50 = vector.broadcast %49 : vector<1x8x96xf32> to vector<7x8x96xf32>
    %51 = arith.mulf %48, %50 : vector<7x8x96xf32>
    %52 = arith.addf %46, %51 : vector<7x8x96xf32>
    %c64 = arith.constant 64 : index
    %c0_11 = arith.constant 0 : index
    %53 = vector.load %arg1[%c64, %c0_11] : memref<80x96xf32, #tpu.memory_space<vmem>>, vector<8x96xf32>
    %54 = vector.extract_strided_slice %5 {offsets = [2, 0, 0], sizes = [7, 8, 96], strides = [1, 1, 1]} : vector<9x8x96xf32> to vector<7x8x96xf32>
    %55 = vector.shape_cast %53 : vector<8x96xf32> to vector<1x8x96xf32>
    %56 = vector.broadcast %55 : vector<1x8x96xf32> to vector<7x8x96xf32>
    %57 = arith.mulf %54, %56 : vector<7x8x96xf32>
    %58 = arith.addf %52, %57 : vector<7x8x96xf32>
    %cst_12 = arith.constant dense<0.000000e+00> : vector<8x96xf32>
    %59 = vector.multi_reduction <add>, %58, %cst_12 [0] : vector<7x8x96xf32> to vector<8x96xf32>
    %60 = arith.mulf %58, %58 : vector<7x8x96xf32>
    %cst_13 = arith.constant dense<0.000000e+00> : vector<8x96xf32>
    %61 = vector.multi_reduction <add>, %60, %cst_13 [0] : vector<7x8x96xf32> to vector<8x96xf32>
    %62 = vector.extract_strided_slice %59 {offsets = [0, 0], sizes = [7, 96], strides = [1, 1]} : vector<8x96xf32> to vector<7x96xf32>
    %cst_14 = arith.constant dense<0.000000e+00> : vector<96xf32>
    %63 = vector.multi_reduction <add>, %62, %cst_14 [0] : vector<7x96xf32> to vector<96xf32>
    %64 = vector.shape_cast %63 : vector<96xf32> to vector<1x96xf32>
    %65 = vector.extract_strided_slice %61 {offsets = [0, 0], sizes = [7, 96], strides = [1, 1]} : vector<8x96xf32> to vector<7x96xf32>
    %cst_15 = arith.constant dense<0.000000e+00> : vector<96xf32>
    %66 = vector.multi_reduction <add>, %65, %cst_15 [0] : vector<7x96xf32> to vector<96xf32>
    %67 = vector.shape_cast %66 : vector<96xf32> to vector<1x96xf32>
    %cst_16 = arith.constant 0.0204081628 : f32
    %68 = vector.broadcast %cst_16 : f32 to vector<1x96xf32>
    %69 = arith.mulf %64, %68 : vector<1x96xf32>
    %cst_17 = arith.constant 0.0204081628 : f32
    %70 = vector.broadcast %cst_17 : f32 to vector<1x96xf32>
    %71 = arith.mulf %67, %70 : vector<1x96xf32>
    %72 = arith.mulf %69, %69 : vector<1x96xf32>
    %73 = arith.subf %71, %72 : vector<1x96xf32>
    %cst_18 = arith.constant 0.000000e+00 : f32
    %74 = vector.broadcast %cst_18 : f32 to vector<1x96xf32>
    %75 = arith.maximumf %73, %74 : vector<1x96xf32>
    %c72 = arith.constant 72 : index
    %c0_19 = arith.constant 0 : index
    %76 = vector.load %arg1[%c72, %c0_19] : memref<80x96xf32, #tpu.memory_space<vmem>>, vector<1x96xf32>
    %c73 = arith.constant 73 : index
    %c0_20 = arith.constant 0 : index
    %77 = vector.load %arg1[%c73, %c0_20] : memref<80x96xf32, #tpu.memory_space<vmem>>, vector<1x96xf32>
    %cst_21 = arith.constant 9.99999974E-6 : f32
    %78 = vector.broadcast %cst_21 : f32 to vector<1x96xf32>
    %79 = arith.addf %75, %78 : vector<1x96xf32>
    %80 = math.rsqrt %79 : vector<1x96xf32>
    %81 = arith.mulf %76, %80 : vector<1x96xf32>
    %82 = arith.mulf %69, %81 : vector<1x96xf32>
    %83 = arith.subf %77, %82 : vector<1x96xf32>
    %84 = vector.shape_cast %58 : vector<7x8x96xf32> to vector<56x96xf32>
    %85 = vector.broadcast %81 : vector<1x96xf32> to vector<56x96xf32>
    %86 = arith.mulf %84, %85 : vector<56x96xf32>
    %87 = vector.broadcast %83 : vector<1x96xf32> to vector<56x96xf32>
    %88 = arith.addf %86, %87 : vector<56x96xf32>
    %89 = arith.truncf %88 : vector<56x96xf32> to vector<56x96xbf16>
    %c0_22 = arith.constant 0 : index
    %c0_23 = arith.constant 0 : index
    %90 = vector.load %arg2[%c0_22, %c0_23] : memref<96x128xbf16, #tpu.memory_space<vmem>>, vector<96x128xbf16>
    %cst_24 = arith.constant dense<0.000000e+00> : vector<56x128xf32>
    %91 = tpu.matmul %89, %90, %cst_24 {dimension_numbers = #tpu.dot_dimension_numbers<[1], [0], [0], [1], [0, 0, 1, 1], [], []>} : vector<56x96xbf16>, vector<96x128xbf16>, vector<56x128xf32> -> vector<56x128xf32>
    %c0_25 = arith.constant 0 : index
    %c0_26 = arith.constant 0 : index
    %92 = vector.load %arg3[%c0_25, %c0_26] : memref<56x128xf32, #tpu.memory_space<vmem>>, vector<56x128xf32>
    tpu.vector_store %arg3[%c0_25, %c0_26], %91 {strides = array<i32>} : memref<56x128xf32, #tpu.memory_space<vmem>>, vector<56x128xf32>,
    return
  }
}

</mosaic_0001>

<bundles_post_ra>
// kernel: fused_forward.1
= control target key start
LH: loop header
LB: loop body
LE: loop exit
PB: predicated region body
PF: predicated region fallthrough
CT: control target
= control target key end

     0   :  { %vm91_vm0 = vcmask 1046528   ;;  %vm159_vm1 = vcmask 1045504   ;;  %vm493_vm2 = vcmask 785408   ;;  %vm527_vm3 = vcmask 784384   ;;  %s1186_s2 = inlined_call_operand.vmem [shape: bf16[96,128], index: 2, kind: input, shape index: {}]   ;;  %s1187_s0 = inlined_call_operand.vmem [shape: f32[9,10,96], index: 0, kind: input, shape index: {}]   ;;  %s1188_s1 = inlined_call_operand.vmem [shape: f32[80,96], index: 1, kind: input, shape index: {}]   ;;  %s1189_s3 = inlined_call_operand.vmem [shape: f32[56,128], index: 3, kind: output, shape index: {}]  }
   0x1   :  { %v767_v0 = vld [vmem:[%s1186_s2] sm:$0xff]   ;;  %v768_v1 = vld [vmem:[%s1186_s2 + $0x8] sm:$0xff]   ;;  %v769_v2 = vld [vmem:[%s1186_s2 + $0x10] sm:$0xff]  }
   0x2   :  { %735 = vmatprep.subr.bf16.mxu0 %v767_v0  ;;  %755 = vmatprep.subr.bf16.mxu1 %v767_v0  ;;  %v15_v3 = vld [vmem:[%s1187_s0] sm:$0xff]  ;;  %v810_v4 = vld [vmem:[%s1187_s0 + $0x8] sm:$0x3]  ;;  %v17_v5 = vld [vmem:[%s1187_s0 + $0x10] sm:$0xff] }
   0x3   :  { %736 = vmatpush3.bf16.msra.mxu0 %v767_v0  ;;  %761 = vmatpush3.bf16.msra.mxu1 %v767_v0  ;;  %v770_v6 = vld [vmem:[%s1186_s2 + $0x18] sm:$0xff]   ;;  %v19_v8 = vld [vmem:[%s1187_s0 + $0x20] sm:$0xff]  ;;  %v20_v9 = vld [vmem:[%s1187_s0 + $0x28] sm:$0x3]  ;;  %v833_v12 = vmax.f32 %v15_v3, 0.0  ;;  %v34_v16 = vmax.f32 %v810_v4, 0.0 }
   0x4   :  { %737 = vmatprep.subr.bf16.mxu0 %v768_v1  ;;  %756 = vmatprep.subr.bf16.mxu1 %v768_v1  ;;  %v18_v7 = vld [vmem:[%s1187_s0 + $0x18] sm:$0x3]  ;;  %v21_v10 = vld [vmem:[%s1187_s0 + $0x30] sm:$0xff]  ;;  %v23_v13 = vld [vmem:[%s1187_s0 + $0x40] sm:$0xff]  ;;  %v845_v17 = vmax.f32 %v17_v5, 0.0  ;;  %v870_v26 = vmax.f32 %v19_v8, 0.0 }
   0x5   :  { %v22_v11 = vld [vmem:[%s1187_s0 + $0x38] sm:$0x3]  ;;  %v24_v14 = vld [vmem:[%s1187_s0 + $0x48] sm:$0x3]  ;;  %v25_v15 = vld [vmem:[%s1187_s0 + $0x50] sm:$0xff]  ;;  %v859_v22 = vmax.f32 %v18_v7, 0.0 }
   0x6   :  { %v771_v18 = vld [vmem:[%s1186_s2 + $0x20] sm:$0xff]   ;;  %v26_v19 = vld [vmem:[%s1187_s0 + $0x58] sm:$0x3]  ;;  %v28_v21 = vld [vmem:[%s1187_s0 + $0x68] sm:$0x3]  ;;  %v872_v27 = vmax.f32 %v20_v9, 0.0 }
   0x7   :  { %738 = vmatpush3.bf16.msra.mxu0 %v768_v1  ;;  %762 = vmatpush3.bf16.msra.mxu1 %v768_v1  ;;  %v27_v20 = vld [vmem:[%s1187_s0 + $0x60] sm:$0xff]  ;;  %v29_v23 = vld [vmem:[%s1187_s0 + $0x70] sm:$0xff]  ;;  %v30_v24 = vld [vmem:[%s1187_s0 + $0x78] sm:$0x3]  ;;  %v874_v28 = vmax.f32 %v21_v10, 0.0  ;;  %v876_v29 = vmax.f32 %v22_v11, 0.0 }
   0x8   :  { %739 = vmatprep.subr.bf16.mxu0 %v769_v2  ;;  %757 = vmatprep.subr.bf16.mxu1 %v769_v2  ;;  %v31_v25 = vld [vmem:[%s1187_s0 + $0x80] sm:$0xff]  ;;  %v878_v30 = vmax.f32 %v23_v13, 0.0  ;;  %v880_v31 = vmax.f32 %v24_v14, 0.0  ;;  %v59_v33 = vld [vmem:[%s1188_s1 + $0x8] sm:$0xff]  ;;  %v888_v34 = vmax.f32 %v25_v15, 0.0  ;;  %v890_v35 = vmax.f32 %v26_v19, 0.0 }
   0x9   :  { %v51_v32 = vld [vmem:[%s1188_s1] sm:$0xff]  ;;  %v892_v36 = vmax.f32 %v27_v20, 0.0  ;;  %v894_v37 = vmax.f32 %v28_v21, 0.0  ;;  %v127_v38 = vld [vmem:[%s1188_s1 + $0x10] sm:$0xff]  ;;  %v899_v39 = vmax.f32 %v29_v23, 0.0  ;;  %v901_v40 = vmax.f32 %v30_v24, 0.0 }
   0xa   :  { %v903_v41 = vmax.f32 %v31_v25, 0.0  ;;  %v52_v42 = vmul.f32 %v51_v32, %v833_v12  ;;  %v53_v43 = vmul.f32 %v51_v32, %v845_v17  ;;  %v54_v44 = vmul.f32 %v51_v32, %v870_v26  ;;  %v772_v47 = vld [vmem:[%s1186_s2 + $0x28] sm:$0xff]  }
   0xb   :  { %740 = vmatpush3.bf16.msra.mxu0 %v769_v2  ;;  %763 = vmatpush3.bf16.msra.mxu1 %v769_v2  ;;  %v55_v45 = vmul.f32 %v51_v32, %v874_v28  ;;  %v61_v46 = vrot.slane %v59_v33, 7  ;;  %v56_v48 = vmul.f32 %v51_v32, %v878_v30  ;;  %v57_v49 = vmul.f32 %v51_v32, %v888_v34 }
   0xc   :  { %741 = vmatprep.subr.bf16.mxu0 %v770_v6  ;;  %758 = vmatprep.subr.bf16.mxu1 %v770_v6  ;;  %v58_v50 = vmul.f32 %v51_v32, %v892_v36  ;;  %v915_v51 = vrot.slane %v127_v38, 6 }
   0xd   :  { %v63_v52 = vmul.f32 %v61_v46, %v833_v12  ;;  %v64_v53 = vmul.f32 %v61_v46, %v34_v16  ;;  %v65_v54 = vmul.f32 %v61_v46, %v845_v17  ;;  %v66_v55 = vmul.f32 %v61_v46, %v859_v22 }
   0xe   :  { %v67_v56 = vmul.f32 %v61_v46, %v870_v26  ;;  %v68_v57 = vmul.f32 %v61_v46, %v872_v27  ;;  %v69_v58 = vmul.f32 %v61_v46, %v874_v28  ;;  %v70_v59 = vmul.f32 %v61_v46, %v876_v29 }
   0xf   :  { %742 = vmatpush3.bf16.msra.mxu0 %v770_v6  ;;  %764 = vmatpush3.bf16.msra.mxu1 %v770_v6  ;;  %v71_v60 = vmul.f32 %v61_v46, %v878_v30  ;;  %v72_v61 = vmul.f32 %v61_v46, %v880_v31  ;;  %v73_v62 = vmul.f32 %v61_v46, %v888_v34  ;;  %v92_v63 = vrot.slane %v63_v52, 1 }
  0x10   :  { %743 = vmatprep.subr.bf16.mxu0 %v771_v18  ;;  %759 = vmatprep.subr.bf16.mxu1 %v771_v18  ;;  %v74_v0 = vmul.f32 %v61_v46, %v890_v35  ;;  %v75_v1 = vmul.f32 %v61_v46, %v892_v36  ;;  %v76_v2 = vmul.f32 %v61_v46, %v894_v37  ;;  %v93_v3 = vrot.slane %v64_v53, 1 }
  0x11   :  { %v95_v5 = vrot.slane %v65_v54, 1  ;;  %v96_v6 = vrot.slane %v66_v55, 1  ;;  %v98_v7 = vrot.slane %v67_v56, 1  ;;  %v99_v8 = vrot.slane %v68_v57, 1 }
  0x12   :  { %v94_v9 = vsel %vm91_vm0, %v92_v63, %v93_v3  ;;  %v101_v10 = vrot.slane %v69_v58, 1  ;;  %v102_v11 = vrot.slane %v70_v59, 1  ;;  %v104_v13 = vrot.slane %v71_v60, 1 }
  0x13   :  { %744 = vmatpush3.bf16.msra.mxu0 %v771_v18  ;;  %765 = vmatpush3.bf16.msra.mxu1 %v771_v18  ;;  %v97_v14 = vsel %vm91_vm0, %v95_v5, %v96_v6  ;;  %v100_v15 = vsel %vm91_vm0, %v98_v7, %v99_v8  ;;  %v105_v18 = vrot.slane %v72_v61, 1  ;;  %v107_v19 = vrot.slane %v73_v62, 1 }
  0x14   :  { %745 = vmatprep.subr.bf16.mxu0 %v772_v47  ;;  %760 = vmatprep.subr.bf16.mxu1 %v772_v47  ;;  %v103_v20 = vsel %vm91_vm0, %v101_v10, %v102_v11  ;;  %v108_v21 = vrot.slane %v74_v0, 1  ;;  %v110_v23 = vrot.slane %v75_v1, 1  ;;  %v111_v24 = vrot.slane %v76_v2, 1 }
  0x15   :  { %v106_v25 = vsel %vm91_vm0, %v104_v13, %v105_v18  ;;  %v120_v32 = vadd.f32 %v94_v9, %v52_v42  ;;  %v121_v33 = vadd.f32 %v97_v14, %v53_v43  ;;  %v122_v38 = vadd.f32 %v100_v15, %v54_v44  ;;  %v195_v13 = vld [vmem:[%s1188_s1 + $0x18] sm:$0xff] }
  0x16   :  { %v109_v46 = vsel %vm91_vm0, %v107_v19, %v108_v21  ;;  %v123_v52 = vadd.f32 %v103_v20, %v55_v45  ;;  %v124_v53 = vadd.f32 %v106_v25, %v56_v48  ;;  %v131_v56 = vmul.f32 %v915_v51, %v833_v12 }
  0x17   :  { %746 = vmatpush3.bf16.msra.mxu0 %v772_v47  ;;  %766 = vmatpush3.bf16.msra.mxu1 %v772_v47  ;;  %v112_v47 = vsel %vm91_vm0, %v110_v23, %v111_v24  ;;  %v125_v54 = vadd.f32 %v109_v46, %v57_v49  ;;  %v132_v57 = vmul.f32 %v915_v51, %v34_v16 }
  0x18   :  { %v126_v55 = vadd.f32 %v112_v47, %v58_v50  ;;  %v133_v42 = vmul.f32 %v915_v51, %v845_v17  ;;  %v134_v43 = vmul.f32 %v915_v51, %v859_v22  ;;  %v135_v44 = vmul.f32 %v915_v51, %v870_v26 }
  0x19   :  { %v136_v45 = vmul.f32 %v915_v51, %v872_v27  ;;  %v137_v48 = vmul.f32 %v915_v51, %v874_v28  ;;  %v138_v4 = vmul.f32 %v915_v51, %v876_v29  ;;  %v139_v12 = vmul.f32 %v915_v51, %v878_v30 }
  0x1a   :  { %v140_v16 = vmul.f32 %v915_v51, %v880_v31  ;;  %v141_v49 = vmul.f32 %v915_v51, %v888_v34  ;;  %v142_v50 = vmul.f32 %v915_v51, %v890_v35  ;;  %v143_v58 = vmul.f32 %v915_v51, %v892_v36 }
  0x1b   :  { %v144_v59 = vmul.f32 %v915_v51, %v894_v37  ;;  %v160_v60 = vrot.slane %v131_v56, 2  ;;  %v161_v61 = vrot.slane %v132_v57, 2  ;;  %v163_v62 = vrot.slane %v133_v42, 2  ;;  %v210_v57 = vld [vmem:[%s1188_s1 + $0x20] sm:$0xff] }
  0x1c   :  { %v164_v63 = vrot.slane %v134_v43, 2  ;;  %v166_v0 = vrot.slane %v135_v44, 2  ;;  %v167_v1 = vrot.slane %v136_v45, 2  ;;  %v169_v2 = vrot.slane %v137_v48, 2 }
  0x1d   :  { %v170_v3 = vrot.slane %v138_v4, 2  ;;  %v162_v5 = vsel %vm159_vm1, %v160_v60, %v161_v61  ;;  %v172_v7 = vrot.slane %v139_v12, 2  ;;  %v173_v8 = vrot.slane %v140_v16, 2 }
  0x1e   :  { %v165_v6 = vsel %vm159_vm1, %v163_v62, %v164_v63  ;;  %v168_v9 = vsel %vm159_vm1, %v166_v0, %v167_v1  ;;  %v175_v11 = vrot.slane %v141_v49, 2  ;;  %v176_v51 = vrot.slane %v142_v50, 2 }
  0x1f   :  { %v171_v10 = vsel %vm159_vm1, %v169_v2, %v170_v3  ;;  %v174_v14 = vsel %vm159_vm1, %v172_v7, %v173_v8  ;;  %v178_v15 = vrot.slane %v143_v58, 2  ;;  %v179_v18 = vrot.slane %v144_v59, 2 }
  0x20   :  { %v188_v19 = vadd.f32 %v162_v5, %v120_v32  ;;  %v177_v20 = vsel %vm159_vm1, %v175_v11, %v176_v51  ;;  %v189_v21 = vadd.f32 %v165_v6, %v121_v33  ;;  %v190_v23 = vadd.f32 %v168_v9, %v122_v38  ;;  %v277_v33 = vld [vmem:[%s1188_s1 + $0x28] sm:$0xff] }
  0x21   :  { %v191_v24 = vadd.f32 %v171_v10, %v123_v52  ;;  %v180_v25 = vsel %vm159_vm1, %v178_v15, %v179_v18  ;;  %v192_v46 = vadd.f32 %v174_v14, %v124_v53  ;;  %v193_v47 = vadd.f32 %v177_v20, %v125_v54 }
  0x22   :  { %v196_v56 = vmul.f32 %v195_v13, %v845_v17  ;;  %v194_v42 = vadd.f32 %v180_v25, %v126_v55  ;;  %v197_v43 = vmul.f32 %v195_v13, %v870_v26  ;;  %v198_v32 = vmul.f32 %v195_v13, %v874_v28 }
  0x23   :  { %v199_v44 = vmul.f32 %v195_v13, %v878_v30  ;;  %v200_v38 = vmul.f32 %v195_v13, %v888_v34  ;;  %v201_v52 = vmul.f32 %v195_v13, %v892_v36  ;;  %v202_v53 = vmul.f32 %v195_v13, %v899_v39 }
  0x24   :  { %v203_v54 = vadd.f32 %v196_v56, %v188_v19  ;;  %v204_v45 = vadd.f32 %v197_v43, %v189_v21  ;;  %v205_v48 = vadd.f32 %v198_v32, %v190_v23  ;;  %v212_v4 = vrot.slane %v210_v57, 7 }
  0x25   :  { %v206_v55 = vadd.f32 %v199_v44, %v191_v24  ;;  %v207_v12 = vadd.f32 %v200_v38, %v192_v46  ;;  %v208_v16 = vadd.f32 %v201_v52, %v193_v47  ;;  %v209_v49 = vadd.f32 %v202_v53, %v194_v42 }
  0x26   :  { %v279_v50 = vrot.slane %v277_v33, 6  ;;  %v214_v58 = vmul.f32 %v212_v4, %v845_v17  ;;  %v215_v59 = vmul.f32 %v212_v4, %v859_v22  ;;  %v216_v60 = vmul.f32 %v212_v4, %v870_v26 }
  0x27   :  { %v217_v61 = vmul.f32 %v212_v4, %v872_v27  ;;  %v218_v62 = vmul.f32 %v212_v4, %v874_v28  ;;  %v219_v63 = vmul.f32 %v212_v4, %v876_v29  ;;  %v220_v0 = vmul.f32 %v212_v4, %v878_v30 }
  0x28   :  { %v221_v1 = vmul.f32 %v212_v4, %v880_v31  ;;  %v222_v2 = vmul.f32 %v212_v4, %v888_v34  ;;  %v223_v3 = vmul.f32 %v212_v4, %v890_v35  ;;  %v224_v5 = vmul.f32 %v212_v4, %v892_v36 }
  0x29   :  { %v225_v6 = vmul.f32 %v212_v4, %v894_v37  ;;  %v226_v7 = vmul.f32 %v212_v4, %v899_v39  ;;  %v227_v8 = vmul.f32 %v212_v4, %v901_v40  ;;  %v242_v9 = vrot.slane %v214_v58, 1 }
  0x2a   :  { %v243_v10 = vrot.slane %v215_v59, 1  ;;  %v245_v11 = vrot.slane %v216_v60, 1  ;;  %v246_v51 = vrot.slane %v217_v61, 1  ;;  %v248_v13 = vrot.slane %v218_v62, 1 }
  0x2b   :  { %v249_v14 = vrot.slane %v219_v63, 1  ;;  %v251_v18 = vrot.slane %v220_v0, 1  ;;  %v252_v19 = vrot.slane %v221_v1, 1  ;;  %v254_v20 = vrot.slane %v222_v2, 1 }
  0x2c   :  { %v244_v15 = vsel %vm91_vm0, %v242_v9, %v243_v10  ;;  %v247_v21 = vsel %vm91_vm0, %v245_v11, %v246_v51  ;;  %v255_v24 = vrot.slane %v223_v3, 1  ;;  %v257_v25 = vrot.slane %v224_v5, 1 }
  0x2d   :  { %v250_v23 = vsel %vm91_vm0, %v248_v13, %v249_v14  ;;  %v253_v46 = vsel %vm91_vm0, %v251_v18, %v252_v19  ;;  %v258_v47 = vrot.slane %v225_v6, 1  ;;  %v260_v56 = vrot.slane %v226_v7, 1  ;;  %v344_v18 = vld [vmem:[%s1188_s1 + $0x30] sm:$0xff]  ;;  %v1036_v19 = vld [vmem:[%s1187_s0 + $0x88] sm:$0x3] }
  0x2e   :  { %v261_v57 = vrot.slane %v227_v8, 1  ;;  %v256_v42 = vsel %vm91_vm0, %v254_v20, %v255_v24  ;;  %v270_v43 = vadd.f32 %v244_v15, %v203_v54  ;;  %v271_v32 = vadd.f32 %v247_v21, %v204_v45 }
  0x2f   :  { %v272_v44 = vadd.f32 %v250_v23, %v205_v48  ;;  %v259_v33 = vsel %vm91_vm0, %v257_v25, %v258_v47  ;;  %v273_v52 = vadd.f32 %v253_v46, %v206_v55  ;;  %v274_v53 = vadd.f32 %v256_v42, %v207_v12 }
  0x30   :  { %v262_v38 = vsel %vm91_vm0, %v260_v56, %v261_v57  ;;  %v275_v4 = vadd.f32 %v259_v33, %v208_v16  ;;  %v281_v59 = vmul.f32 %v279_v50, %v845_v17  ;;  %v282_v60 = vmul.f32 %v279_v50, %v859_v22 }
  0x31   :  { %v276_v58 = vadd.f32 %v262_v38, %v209_v49  ;;  %v283_v61 = vmul.f32 %v279_v50, %v870_v26  ;;  %v284_v62 = vmul.f32 %v279_v50, %v872_v27  ;;  %v285_v54 = vmul.f32 %v279_v50, %v874_v28 }
  0x32   :  { %v286_v45 = vmul.f32 %v279_v50, %v876_v29  ;;  %v287_v48 = vmul.f32 %v279_v50, %v878_v30  ;;  %v288_v63 = vmul.f32 %v279_v50, %v880_v31  ;;  %v289_v55 = vmul.f32 %v279_v50, %v888_v34 }
  0x33   :  { %v290_v12 = vmul.f32 %v279_v50, %v890_v35  ;;  %v291_v17 = vmul.f32 %v279_v50, %v892_v36  ;;  %v292_v22 = vmul.f32 %v279_v50, %v894_v37  ;;  %v293_v16 = vmul.f32 %v279_v50, %v899_v39 }
  0x34   :  { %v294_v49 = vmul.f32 %v279_v50, %v901_v40  ;;  %v309_v0 = vrot.slane %v281_v59, 2  ;;  %v310_v1 = vrot.slane %v282_v60, 2  ;;  %v312_v2 = vrot.slane %v283_v61, 2  ;;  %v359_v59 = vld [vmem:[%s1188_s1 + $0x38] sm:$0xff] }
  0x35   :  { %v313_v3 = vrot.slane %v284_v62, 2  ;;  %v315_v5 = vrot.slane %v285_v54, 2  ;;  %v316_v6 = vrot.slane %v286_v45, 2  ;;  %v318_v7 = vrot.slane %v287_v48, 2 }
  0x36   :  { %v319_v8 = vrot.slane %v288_v63, 2  ;;  %v311_v9 = vsel %vm159_vm1, %v309_v0, %v310_v1  ;;  %v321_v11 = vrot.slane %v289_v55, 2  ;;  %v322_v51 = vrot.slane %v290_v12, 2 }
  0x37   :  { %v314_v10 = vsel %vm159_vm1, %v312_v2, %v313_v3  ;;  %v317_v13 = vsel %vm159_vm1, %v315_v5, %v316_v6  ;;  %v324_v15 = vrot.slane %v291_v17, 2  ;;  %v325_v50 = vrot.slane %v292_v22, 2 }
  0x38   :  { %v320_v14 = vsel %vm159_vm1, %v318_v7, %v319_v8  ;;  %v323_v20 = vsel %vm159_vm1, %v321_v11, %v322_v51  ;;  %v327_v21 = vrot.slane %v293_v16, 2  ;;  %v328_v23 = vrot.slane %v294_v49, 2 }
  0x39   :  { %v337_v24 = vadd.f32 %v311_v9, %v270_v43  ;;  %v326_v25 = vsel %vm159_vm1, %v324_v15, %v325_v50  ;;  %v338_v46 = vadd.f32 %v314_v10, %v271_v32  ;;  %v339_v47 = vadd.f32 %v317_v13, %v272_v44  ;;  %v426_v44 = vld [vmem:[%s1188_s1 + $0x40] sm:$0xff] }
  0x3a   :  { %v340_v56 = vadd.f32 %v320_v14, %v273_v52  ;;  %v329_v57 = vsel %vm159_vm1, %v327_v21, %v328_v23  ;;  %v341_v42 = vadd.f32 %v323_v20, %v274_v53  ;;  %v342_v33 = vadd.f32 %v326_v25, %v275_v4 }
  0x3b   :  { %v345_v38 = vmul.f32 %v344_v18, %v870_v26  ;;  %v50_v60 = vmax.f32 %v1036_v19, 0.0  ;;  %v346_v61 = vmul.f32 %v344_v18, %v874_v28  ;;  %v347_v43 = vmul.f32 %v344_v18, %v878_v30 }
  0x3c   :  { %v348_v32 = vmul.f32 %v344_v18, %v888_v34  ;;  %v343_v52 = vadd.f32 %v329_v57, %v276_v58  ;;  %v349_v53 = vmul.f32 %v344_v18, %v892_v36  ;;  %v350_v4 = vmul.f32 %v344_v18, %v899_v39 }
  0x3d   :  { %v351_v62 = vmul.f32 %v344_v18, %v903_v41  ;;  %v352_v54 = vadd.f32 %v345_v38, %v337_v24  ;;  %v353_v45 = vadd.f32 %v346_v61, %v338_v46  ;;  %v354_v48 = vadd.f32 %v347_v43, %v339_v47 }
  0x3e   :  { %v361_v63 = vrot.slane %v359_v59, 7  ;;  %v355_v55 = vadd.f32 %v348_v32, %v340_v56  ;;  %v356_v12 = vadd.f32 %v349_v53, %v341_v42  ;;  %v357_v17 = vadd.f32 %v350_v4, %v342_v33 }
  0x3f   :  { %v428_v22 = vrot.slane %v426_v44, 6  ;;  %v358_v59 = vadd.f32 %v351_v62, %v343_v52 }
  0x40   :  { %v363_v16 = vmul.f32 %v361_v63, %v870_v26  ;;  %v364_v49 = vmul.f32 %v361_v63, %v872_v27  ;;  %v365_v58 = vmul.f32 %v361_v63, %v874_v28  ;;  %v366_v0 = vmul.f32 %v361_v63, %v876_v29 }
  0x41   :  { %v367_v1 = vmul.f32 %v361_v63, %v878_v30  ;;  %v368_v2 = vmul.f32 %v361_v63, %v880_v31  ;;  %v369_v3 = vmul.f32 %v361_v63, %v888_v34  ;;  %v370_v5 = vmul.f32 %v361_v63, %v890_v35 }
  0x42   :  { %v371_v6 = vmul.f32 %v361_v63, %v892_v36  ;;  %v372_v7 = vmul.f32 %v361_v63, %v894_v37  ;;  %v373_v8 = vmul.f32 %v361_v63, %v899_v39  ;;  %v374_v9 = vmul.f32 %v361_v63, %v901_v40 }
  0x43   :  { %v375_v10 = vmul.f32 %v361_v63, %v903_v41  ;;  %v376_v11 = vmul.f32 %v361_v63, %v50_v60  ;;  %v391_v51 = vrot.slane %v363_v16, 1  ;;  %v392_v13 = vrot.slane %v364_v49, 1 }
  0x44   :  { %v394_v14 = vrot.slane %v365_v58, 1  ;;  %v395_v15 = vrot.slane %v366_v0, 1  ;;  %v397_v50 = vrot.slane %v367_v1, 1  ;;  %v398_v18 = vrot.slane %v368_v2, 1 }
  0x45   :  { %v393_v20 = vsel %vm91_vm0, %v391_v51, %v392_v13  ;;  %v400_v21 = vrot.slane %v369_v3, 1  ;;  %v401_v23 = vrot.slane %v370_v5, 1  ;;  %v403_v24 = vrot.slane %v371_v6, 1 }
  0x46   :  { %v396_v25 = vsel %vm91_vm0, %v394_v14, %v395_v15  ;;  %v399_v46 = vsel %vm91_vm0, %v397_v50, %v398_v18  ;;  %v404_v47 = vrot.slane %v372_v7, 1  ;;  %v406_v56 = vrot.slane %v373_v8, 1 }
  0x47   :  { %v402_v57 = vsel %vm91_vm0, %v400_v21, %v401_v23  ;;  %v407_v42 = vrot.slane %v374_v9, 1  ;;  %v409_v33 = vrot.slane %v375_v10, 1  ;;  %v410_v38 = vrot.slane %v376_v11, 1 }
  0x48   :  { %v405_v61 = vsel %vm91_vm0, %v403_v24, %v404_v47  ;;  %v419_v43 = vadd.f32 %v393_v20, %v352_v54  ;;  %v420_v32 = vadd.f32 %v396_v25, %v353_v45  ;;  %v421_v4 = vadd.f32 %v399_v46, %v354_v48 }
  0x49   :  { %v408_v44 = vsel %vm91_vm0, %v406_v56, %v407_v42  ;;  %v411_v53 = vsel %vm91_vm0, %v409_v33, %v410_v38  ;;  %v422_v63 = vadd.f32 %v402_v57, %v355_v55  ;;  %v423_v16 = vadd.f32 %v405_v61, %v356_v12 }
  0x4a   :  { %v424_v49 = vadd.f32 %v408_v44, %v357_v17  ;;  %v430_v58 = vmul.f32 %v428_v22, %v870_v26  ;;  %v431_v0 = vmul.f32 %v428_v22, %v872_v27  ;;  %v432_v1 = vmul.f32 %v428_v22, %v874_v28 }
  0x4b   :  { %v433_v52 = vmul.f32 %v428_v22, %v876_v29  ;;  %v434_v62 = vmul.f32 %v428_v22, %v878_v30  ;;  %v435_v54 = vmul.f32 %v428_v22, %v880_v31  ;;  %v436_v45 = vmul.f32 %v428_v22, %v888_v34 }
  0x4c   :  { %v437_v48 = vmul.f32 %v428_v22, %v890_v35  ;;  %v438_v55 = vmul.f32 %v428_v22, %v892_v36  ;;  %v439_v12 = vmul.f32 %v428_v22, %v894_v37  ;;  %v440_v26 = vmul.f32 %v428_v22, %v899_v39 }
  0x4d   :  { %v441_v27 = vmul.f32 %v428_v22, %v901_v40  ;;  %v442_v28 = vmul.f32 %v428_v22, %v903_v41  ;;  %v443_v29 = vmul.f32 %v428_v22, %v50_v60  ;;  %v458_v30 = vrot.slane %v430_v58, 2 }
  0x4e   :  { %v459_v17 = vrot.slane %v431_v0, 2  ;;  %v461_v31 = vrot.slane %v432_v1, 2  ;;  %v462_v2 = vrot.slane %v433_v52, 2  ;;  %v464_v34 = vrot.slane %v434_v62, 2 }
  0x4f   :  { %v465_v3 = vrot.slane %v435_v54, 2  ;;  %v467_v35 = vrot.slane %v436_v45, 2  ;;  %v468_v5 = vrot.slane %v437_v48, 2  ;;  %v470_v39 = vrot.slane %v438_v55, 2 }
  0x50   :  { %v460_v36 = vsel %vm159_vm1, %v458_v30, %v459_v17  ;;  %v463_v37 = vsel %vm159_vm1, %v461_v31, %v462_v2  ;;  %v471_v6 = vrot.slane %v439_v12, 2  ;;  %v473_v19 = vrot.slane %v440_v26, 2 }
  0x51   :  { %v466_v40 = vsel %vm159_vm1, %v464_v34, %v465_v3  ;;  %v469_v41 = vsel %vm159_vm1, %v467_v35, %v468_v5  ;;  %v474_v60 = vrot.slane %v441_v27, 2  ;;  %v476_v7 = vrot.slane %v442_v28, 2 }
  0x52   :  { %v472_v22 = vsel %vm159_vm1, %v470_v39, %v471_v6  ;;  %v477_v8 = vrot.slane %v443_v29, 2  ;;  %v1097_v9 = vadd.f32 %v460_v36, %v419_v43  ;;  %v1100_v11 = vadd.f32 %v463_v37, %v420_v32 }
  0x53   :  { %v475_v10 = vsel %vm159_vm1, %v473_v19, %v474_v60  ;;  %v1102_v51 = vadd.f32 %v466_v40, %v421_v4  ;;  %v1104_v13 = vadd.f32 %v469_v41, %v422_v63  ;;  %v425_v14 = vadd.f32 %v411_v53, %v358_v59 }
  0x54   :  { %v1106_v15 = vadd.f32 %v472_v22, %v423_v16  ;;  %v494_v50 = vsel %vm493_vm2, %v1097_v9, 0.0  ;;  %v478_v18 = vsel %vm159_vm1, %v476_v7, %v477_v8  ;;  %v495_v20 = vsel %vm493_vm2, %v1100_v11, 0.0 }
  0x55   :  { %v497_v21 = vsel %vm493_vm2, %v1102_v51, 0.0  ;;  %v1115_v23 = vadd.f32 %v475_v10, %v424_v49  ;;  %v496_v24 = vadd.f32 %v495_v20, %v494_v50  ;;  %v507_v25 = vmul.f32 %v1097_v9, %v1097_v9 }
  0x56   :  { %v499_v46 = vsel %vm493_vm2, %v1104_v13, 0.0  ;;  %v508_v47 = vmul.f32 %v1100_v11, %v1100_v11  ;;  %v509_v56 = vmul.f32 %v1102_v51, %v1102_v51  ;;  %v510_v57 = vmul.f32 %v1104_v13, %v1104_v13 }
  0x57   :  { %v1127_v42 = vadd.f32 %v478_v18, %v425_v14  ;;  %v498_v33 = vadd.f32 %v497_v21, %v496_v24  ;;  %v501_v38 = vsel %vm493_vm2, %v1106_v15, 0.0  ;;  %v511_v59 = vmul.f32 %v1106_v15, %v1106_v15  ;;  %v547_v14 = vld [vmem:[%s1188_s1 + $0x48] sm:$0x1]  ;;  %v548_v21 = vld [vmem:[%s1188_s1 + $0x49] sm:$0x1] }
  0x58   :  { %v514_v61 = vsel %vm493_vm2, %v507_v25, 0.0  ;;  %v515_v43 = vsel %vm493_vm2, %v508_v47, 0.0  ;;  %v517_v32 = vsel %vm493_vm2, %v509_v56, 0.0  ;;  %v503_v4 = vsel %vm493_vm2, %v1115_v23, 0.0 }
  0x59   :  { %v500_v44 = vadd.f32 %v499_v46, %v498_v33  ;;  %v516_v53 = vadd.f32 %v515_v43, %v514_v61  ;;  %v512_v63 = vmul.f32 %v1115_v23, %v1115_v23  ;;  %v519_v16 = vsel %vm493_vm2, %v510_v57, 0.0 }
  0x5a   :  { %v505_v0 = vsel %vm493_vm2, %v1127_v42, 0.0  ;;  %v513_v1 = vmul.f32 %v1127_v42, %v1127_v42  ;;  %v521_v52 = vsel %vm493_vm2, %v511_v59, 0.0  ;;  %v554_v8 = vlaneseq }
  0x5b   :  { %v502_v49 = vadd.f32 %v501_v38, %v500_v44  ;;  %v518_v58 = vadd.f32 %v517_v32, %v516_v53  ;;  %v523_v45 = vsel %vm493_vm2, %v512_v63, 0.0 }
  0x5c   :  { %v525_v12 = vsel %vm493_vm2, %v513_v1, 0.0  ;;  %v555_v10 = vshrl.u32 %v554_v8, 7 }
  0x5d   :  { %v504_v62 = vadd.f32 %v503_v4, %v502_v49  ;;  %v520_v54 = vadd.f32 %v519_v16, %v518_v58 }
  0x5e   :  { %v556_v50 = vsub.s32 0, %v555_v10 }
  0x5f   :  { %v506_v48 = vadd.f32 %v505_v0, %v504_v62  ;;  %v522_v55 = vadd.f32 %v521_v52, %v520_v54 }
  0x61   :  { %v524_v26 = vadd.f32 %v523_v45, %v522_v55  ;;  %v528_v27 = vsel %vm527_vm3, %v506_v48, 0.0 }
  0x62   :  { %v529_v28 = vrot.slane %v528_v27, 4 }
  0x63   :  { %v526_v29 = vadd.f32 %v525_v12, %v524_v26 }
  0x64   :  { %v530_v30 = vadd.f32 %v529_v28, %v528_v27 }
  0x65   :  { %v535_v17 = vsel %vm527_vm3, %v526_v29, 0.0 }
  0x66   :  { %v531_v31 = vrot.slane %v530_v30, 2  ;;  %v536_v2 = vrot.slane %v535_v17, 4 }
  0x68   :  { %v532_v34 = vadd.f32 %v531_v31, %v530_v30  ;;  %v537_v3 = vadd.f32 %v536_v2, %v535_v17 }
  0x6a   :  { %v533_v35 = vrot.slane %v532_v34, 1  ;;  %v538_v5 = vrot.slane %v537_v3, 2 }
  0x6c   :  { %v534_v36 = vadd.f32 %v533_v35, %v532_v34  ;;  %v539_v37 = vadd.f32 %v538_v5, %v537_v3 }
  0x6e   :  { %v540_v39 = vrot.slane %v539_v37, 1  ;;  %v542_v6 = vmul.f32 0.020408163, %v534_v36 }
  0x70   :  { %v541_v40 = vadd.f32 %v540_v39, %v539_v37  ;;  %v544_v41 = vmul.f32 %v542_v6, %v542_v6 }
  0x72   :  { %v543_v19 = vmul.f32 0.020408163, %v541_v40 }
  0x74   :  { %v545_v60 = vsub.f32 %v543_v19, %v544_v41 }
  0x76   :  { %v546_v22 = vmax.f32 %v545_v60, 0.0 }
  0x78   :  { %v549_v7 = vadd.f32 1e-05, %v546_v22 }
  0x7a   :  { %773 = vrsqrt.f32 %v549_v7 }
  0x84   :  { %v774_v18 = vpop.eup %773 }
  0x85   :  { %v551_v20 = vmul.f32 %v774_v18, %v547_v14 }
  0x87   :  { %v552_v24 = vmul.f32 %v551_v20, %v542_v6  ;;  %v557_v25 = vrot.slane %v551_v20, %v556_v50 }
  0x89   :  { %v553_v46 = vsub.f32 %v548_v21, %v552_v24  ;;  %v558_v47 = vmul.f32 %v557_v25, %v1097_v9  ;;  %v559_v56 = vmul.f32 %v557_v25, %v1100_v11  ;;  %v562_v57 = vmul.f32 %v557_v25, %v1106_v15 }
  0x8a   :  { %v563_v33 = vmul.f32 %v557_v25, %v1115_v23  ;;  %v560_v38 = vmul.f32 %v557_v25, %v1102_v51  ;;  %v561_v59 = vmul.f32 %v557_v25, %v1104_v13  ;;  %v564_v61 = vmul.f32 %v557_v25, %v1127_v42 }
  0x8b   :  { %v568_v43 = vrot.slane %v553_v46, %v556_v50 }
  0x8d   :  { %v569_v32 = vadd.f32 %v568_v43, %v558_v47  ;;  %v570_v44 = vadd.f32 %v568_v43, %v559_v56  ;;  %v573_v53 = vadd.f32 %v568_v43, %v562_v57  ;;  %v574_v4 = vadd.f32 %v568_v43, %v563_v33 }
  0x8e   :  { %v571_v63 = vadd.f32 %v568_v43, %v560_v38  ;;  %v572_v16 = vadd.f32 %v568_v43, %v561_v59  ;;  %v575_v9 = vadd.f32 %v568_v43, %v564_v61 }
  0x8f   :  { %v576_v49 = vpack.c.bf16 %v570_v44, %v569_v32  ;;  %v578_v11 = vpack.c.bf16 %v574_v4, %v573_v53 }
  0x90   :  { %v577_v58 = vpack.c.bf16 %v572_v16, %v571_v63  ;;  %v579_v15 = vpack.c.bf16 %v575_v9, %v575_v9 }
  0x91   :  { %747 = vmatprep.mubr.msk.bf16.mxu0 %vm493_vm2, %v576_v49  ;;  %751 = vmatprep.mubr.msk.bf16.mxu1 %vm493_vm2, %v578_v11 }
  0x92   :  { %748 = vmatmul.mubr.msk.bf16.vlgmr.msra.gmra.mrb[0].mxu0 %vm493_vm2, %v577_v58  ;;  %752 = vmatmul.mubr.msk.bf16.vlgmr.msra.gmra.mrb[0].mxu1 %vm493_vm2, %v579_v15 }
 0x165   :  { %v749_v51 = vpop.f32.mrb[0].mxu0  ;;  %v753_v13 = vpop.f32.mrb[0].mxu1 }
 0x166   :  { %706 = vst [vmem:[%s1189_s3 + $0x10] sm:$0xff] %v749_v51  ;;  %710 = vst [vmem:[%s1189_s3 + $0x30] sm:$0xff] %v753_v13  ;;  %v674_v23 = vpop.f32.mrb[1].mxu0  ;;  %v690_v42 = vpop.f32.mrb[1].mxu1 }
 0x167   :  { %704 = vst [vmem:[%s1189_s3] sm:$0xff] %v674_v23  ;;  %708 = vst [vmem:[%s1189_s3 + $0x20] sm:$0xff] %v690_v42  ;;  %v750_v0 = vpop.f32.mrb[2].mxu0  ;;  %v754_v1 = vpop.f32.mrb[2].mxu1 }
 0x168   :  { %707 = vst [vmem:[%s1189_s3 + $0x18] sm:$0xff] %v750_v0  ;;  %v677_v52 = vpop.f32.mrb[3].mxu0  ;;  %v693_v62 = vpop.f32.mrb[3].mxu1 }
 0x169   :  { %705 = vst [vmem:[%s1189_s3 + $0x8] sm:$0xff] %v677_v52  ;;  %709 = vst [vmem:[%s1189_s3 + $0x28] sm:$0xff] %v693_v62 }

</bundles_post_ra>
